<compile_context>
chip_gen: v5e
topology: v5e:2x2
jax: 0.10.0
libtpu: 0.0.40
codegen_flags: <defaults>
</compile_context>

<pallas_src>
import functools

import jax
import jax.numpy as jnp
from jax import lax
from jax.experimental import pallas as pl
from jax.experimental.pallas import tpu as pltpu


def _round_up(x, m):
    return (x + m - 1) // m * m


# ----------------------------------------------------------------------------
# Fused Pallas kernel: whole Conv1d/ReLU stack for one batch element.
# ----------------------------------------------------------------------------
def _make_stack_kernel(num_layers, kernel_size, stride, tails, cp):
    """tails[l] = #time steps of layer l's input chunk; tails[-1] == 1."""

    def kernel(x_ref, w_ref, b_ref, o_ref, h_ref):
        # x_ref: (1, tails[0], cp)   w_ref: (L, K, cp, cp)   b_ref: (L, 1, cp)
        # o_ref: (1, 1, cp)          h_ref: VMEM scratch (t_pad, cp) f32
        h_ref[pl.ds(0, tails[0]), :] = x_ref[0].astype(jnp.float32)
        for l in range(num_layers):
            t_out = tails[l + 1]
            # Bias folded into the accumulator init (no separate bias add / DMA stream).
            acc = jnp.broadcast_to(b_ref[l], (t_out, cp))
            for k in range(kernel_size):
                if stride == 1:
                    xs = h_ref[pl.ds(k, t_out), :]
                else:
                    xs = h_ref[pl.ds(k, t_out, stride=stride), :]
                acc = acc + jnp.dot(xs, w_ref[l, k],
                                    preferred_element_type=jnp.float32)
            out = jnp.maximum(acc, 0.0)
            if l == num_layers - 1:
                o_ref[0] = out.astype(o_ref.dtype)      # (1, cp): lane-dense store
            else:
                h_ref[pl.ds(0, t_out), :] = out         # stays in VMEM scratch

    return kernel


# ----------------------------------------------------------------------------
# Host glue (all static shape math / one-time packing; no gathers).
# ----------------------------------------------------------------------------
def _receptive_tail(seq_len, num_layers, kernel_size, stride):
    """Per-layer chunk lengths needed to produce only the LAST output time step."""
    lens = [seq_len]
    for _ in range(num_layers):
        nxt = (lens[-1] - kernel_size) // stride + 1
        if nxt < 1:
            raise ValueError("sequence too short for this conv stack")
        lens.append(nxt)
    lo = hi = lens[-1] - 1                       # needed output range of final layer
    out_need = [None] * num_layers
    for l in range(num_layers - 1, -1, -1):
        out_need[l] = (lo, hi)
        lo, hi = lo * stride, hi * stride + kernel_size - 1   # needed inputs of layer l
    x_start = lo
    tails = [hi - lo + 1] + [b - a + 1 for (a, b) in out_need]
    return x_start, tails                        # tails[-1] == 1


def pack_params(params, lane=128):
    """Pad channels to the lane width and stack per-layer weights/biases (done once).

    params[l] = (weight (C_out, C_in_l, K), bias (C_out,)) in PyTorch Conv1d layout.
    Returns w_all (L, K, cp, cp) with w_all[l, k, ci, co] = w[co, ci, k] (zero-padded),
    and b_all (L, 1, cp).
    """
    c_out = params[0][0].shape[0]
    c_in0 = params[0][0].shape[1]
    cp = _round_up(max(c_in0, c_out), lane)
    w_list, b_list = [], []
    for (w, b) in params:
        co, ci, _ = w.shape
        wt = jnp.transpose(w, (2, 1, 0))                       # (K, Ci, Co)
        wt = jnp.pad(wt, ((0, 0), (0, cp - ci), (0, cp - co)))
        w_list.append(wt)
        b_list.append(jnp.pad(b, (0, cp - co))[None, :])
    return (jnp.stack(w_list).astype(jnp.float32),             # (L, K, cp, cp)
            jnp.stack(b_list).astype(jnp.float32))              # (L, 1, cp)


def cnn_encoder_forward(x, w_all, b_all, *, kernel_size, stride, c_out):
    """x: (B, L, C_in) float32; w_all/b_all from pack_params. Returns (B, c_out)."""
    batch, seq_len, c_in = x.shape
    num_layers, k_dim, cp, _ = w_all.shape
    assert k_dim == kernel_size

    x_start, tails = _receptive_tail(seq_len, num_layers, kernel_size, stride)
    t0 = tails[0]

    # Static slice of the receptive-field tail + zero-pad channels to lane width.
    x_tail = lax.slice(x, (0, x_start, 0), (batch, x_start + t0, c_in))
    x_tail = jnp.pad(x_tail, ((0, 0), (0, 0), (0, cp - c_in))).astype(jnp.float32)

    t_pad = max(_round_up(t0, 8), 8)

    flops = 0
    for l in range(num_layers):
        ci = c_in if l == 0 else c_out
        flops += 2 * batch * tails[l + 1] * kernel_size * ci * c_out
    bytes_accessed = 4 * (x_tail.size + w_all.size + b_all.size + batch * cp)

    kernel = _make_stack_kernel(num_layers, kernel_size, stride, tails, cp)
    out = pl.pallas_call(
        kernel,
        out_shape=jax.ShapeDtypeStruct((batch, 1, cp), jnp.float32),
        grid_spec=pltpu.PrefetchScalarGridSpec(
            num_scalar_prefetch=0,
            grid=(batch,),
            in_specs=[
                pl.BlockSpec((1, t0, cp), lambda b: (b, 0, 0)),
                pl.BlockSpec((num_layers, kernel_size, cp, cp),
                             lambda b: (0, 0, 0, 0)),
                pl.BlockSpec((num_layers, 1, cp), lambda b: (0, 0, 0)),
            ],
            out_specs=pl.BlockSpec((1, 1, cp), lambda b: (b, 0, 0)),
            scratch_shapes=[pltpu.VMEM((t_pad, cp), jnp.float32)],
        ),
        compiler_params=pltpu.CompilerParams(
            dimension_semantics=("parallel",)),
        cost_estimate=pl.CostEstimate(
            flops=flops, transcendentals=0, bytes_accessed=bytes_accessed),
    )(x_tail, w_all, b_all)
    return out[:, 0, :c_out]


# ----------------------------------------------------------------------------
# Deterministic parameter init (kaiming-uniform-like weights, zero bias) and
# pure-JAX reference mirroring the PyTorch forward.
# ----------------------------------------------------------------------------
def init_params(key, input_size, output_size, num_layers, kernel_size):
    params = []
    c_in = input_size
    for _ in range(num_layers):
        key, wk = jax.random.split(key)
        fan_in = c_in * kernel_size
        bound = (6.0 / fan_in) ** 0.5
        w = jax.random.uniform(
            wk, (output_size, c_in, kernel_size), jnp.float32, -bound, bound)
        b = jnp.zeros((output_size,), jnp.float32)
        params.append((w, b))
        c_in = output_size
    return params


def cnn_encoder_reference(x, params, stride):
    h = jnp.transpose(x, (0, 2, 1))                             # (B, C, L)
    for (w, b) in params:
        h = lax.conv_general_dilated(
            h, w, window_strides=(stride,), padding="VALID",
            dimension_numbers=("NCH", "OIH", "NCH"))
        h = jnp.maximum(h + b[None, :, None], 0.0)
    h = jnp.transpose(h, (0, 2, 1))                             # (B, L_out, C_out)
    return h[:, -1, :]


if __name__ == "__main__":
    # Module hyperparameters (small shapes consistent with the PyTorch module).
    input_size, output_size = 4, 32
    num_layers, kernel_size, stride = 2, 3, 1
    B, L = 2, 16

    key = jax.random.PRNGKey(0)
    key, xk = jax.random.split(key)
    x = jax.random.normal(xk, (B, L, input_size), jnp.float32)
    params = init_params(key, input_size, output_size, num_layers, kernel_size)

    w_all, b_all = pack_params(params)          # pad/stack once, outside the hot path

    fwd = jax.jit(functools.partial(
        cnn_encoder_forward, kernel_size=kernel_size, stride=stride,
        c_out=output_size))
    out = jax.block_until_ready(fwd(x, w_all, b_all))

    ref = cnn_encoder_reference(x, params, stride)
    assert out.shape == (B, output_size), out.shape
    assert jnp.allclose(out, ref, atol=1e-4, rtol=1e-4), (
        float(jnp.max(jnp.abs(out - ref))))
    print("KERNEL_OK")
</pallas_src>

<mosaic_0001>
module attributes {stable_mosaic.version = 11 : i64} {
  func.func @kernel(%arg0: i32, %arg1: memref<1x5x128xf32, #tpu.memory_space<vmem>>, %arg2: memref<2x3x128x128xf32, #tpu.memory_space<vmem>>, %arg3: memref<2x1x128xf32, #tpu.memory_space<vmem>>, %arg4: memref<1x1x128xf32, #tpu.memory_space<vmem>>, %arg5: memref<8x128xf32, #tpu.memory_space<vmem>>) attributes {dimension_semantics = [#tpu.dimension_semantics<parallel>], iteration_bounds = array<i64: 2>, scalar_prefetch = 0 : i64, scratch_operands = 1 : i64, tpu.core_type = #tpu.core_type<tc>, window_params = [{transform_indices = @transform_0, window_bounds = array<i64: 1, 5, 128>}, {pipeline_mode = #tpu.pipeline_mode<synchronous>, transform_indices = @transform_1, window_bounds = array<i64: 2, 3, 128, 128>}, {pipeline_mode = #tpu.pipeline_mode<synchronous>, transform_indices = @transform_2, window_bounds = array<i64: 2, 1, 128>}, {transform_indices = @transform_3, window_bounds = array<i64: 1, 1, 128>}]} {
    %c0 = arith.constant 0 : index
    %c0_0 = arith.constant 0 : index
    %c0_1 = arith.constant 0 : index
    %0 = vector.load %arg1[%c0, %c0_0, %c0_1] : memref<1x5x128xf32, #tpu.memory_space<vmem>>, vector<1x5x128xf32>
    %1 = vector.shape_cast %0 : vector<1x5x128xf32> to vector<5x128xf32>
    %c0_2 = arith.constant 0 : index
    %c0_3 = arith.constant 0 : index
    %2 = vector.load %arg5[%c0_2, %c0_3] : memref<8x128xf32, #tpu.memory_space<vmem>>, vector<5x128xf32>
    tpu.vector_store %arg5[%c0_2, %c0_3], %1 {strides = array<i32>} : memref<8x128xf32, #tpu.memory_space<vmem>>, vector<5x128xf32>,
    %c0_4 = arith.constant 0 : index
    %c0_5 = arith.constant 0 : index
    %c0_6 = arith.constant 0 : index
    %3 = vector.load %arg3[%c0_4, %c0_5, %c0_6] : memref<2x1x128xf32, #tpu.memory_space<vmem>>, vector<1x1x128xf32>
    %4 = vector.shape_cast %3 : vector<1x1x128xf32> to vector<1x128xf32>
    %5 = vector.shape_cast %4 : vector<1x128xf32> to vector<1x128xf32>
    %6 = vector.broadcast %5 : vector<1x128xf32> to vector<3x128xf32>
    %c0_7 = arith.constant 0 : index
    %c0_8 = arith.constant 0 : index
    %7 = vector.load %arg5[%c0_7, %c0_8] : memref<8x128xf32, #tpu.memory_space<vmem>>, vector<3x128xf32>
    %c0_9 = arith.constant 0 : index
    %c0_10 = arith.constant 0 : index
    %c0_11 = arith.constant 0 : index
    %c0_12 = arith.constant 0 : index
    %8 = vector.load %arg2[%c0_9, %c0_10, %c0_11, %c0_12] : memref<2x3x128x128xf32, #tpu.memory_space<vmem>>, vector<1x1x128x128xf32>
    %9 = vector.shape_cast %8 : vector<1x1x128x128xf32> to vector<128x128xf32>
    %cst = arith.constant dense<0.000000e+00> : vector<3x128xf32>
    %10 = tpu.matmul %7, %9, %cst {dimension_numbers = #tpu.dot_dimension_numbers<[1], [0], [0], [1], [0, 0, 1, 1], [], []>} : vector<3x128xf32>, vector<128x128xf32>, vector<3x128xf32> -> vector<3x128xf32>
    %11 = arith.addf %6, %10 : vector<3x128xf32>
    %c1 = arith.constant 1 : index
    %c0_13 = arith.constant 0 : index
    %12 = vector.load %arg5[%c1, %c0_13] : memref<8x128xf32, #tpu.memory_space<vmem>>, vector<3x128xf32>
    %c0_14 = arith.constant 0 : index
    %c1_15 = arith.constant 1 : index
    %c0_16 = arith.constant 0 : index
    %c0_17 = arith.constant 0 : index
    %13 = vector.load %arg2[%c0_14, %c1_15, %c0_16, %c0_17] : memref<2x3x128x128xf32, #tpu.memory_space<vmem>>, vector<1x1x128x128xf32>
    %14 = vector.shape_cast %13 : vector<1x1x128x128xf32> to vector<128x128xf32>
    %cst_18 = arith.constant dense<0.000000e+00> : vector<3x128xf32>
    %15 = tpu.matmul %12, %14, %cst_18 {dimension_numbers = #tpu.dot_dimension_numbers<[1], [0], [0], [1], [0, 0, 1, 1], [], []>} : vector<3x128xf32>, vector<128x128xf32>, vector<3x128xf32> -> vector<3x128xf32>
    %16 = arith.addf %11, %15 : vector<3x128xf32>
    %c2 = arith.constant 2 : index
    %c0_19 = arith.constant 0 : index
    %17 = vector.load %arg5[%c2, %c0_19] : memref<8x128xf32, #tpu.memory_space<vmem>>, vector<3x128xf32>
    %c0_20 = arith.constant 0 : index
    %c2_21 = arith.constant 2 : index
    %c0_22 = arith.constant 0 : index
    %c0_23 = arith.constant 0 : index
    %18 = vector.load %arg2[%c0_20, %c2_21, %c0_22, %c0_23] : memref<2x3x128x128xf32, #tpu.memory_space<vmem>>, vector<1x1x128x128xf32>
    %19 = vector.shape_cast %18 : vector<1x1x128x128xf32> to vector<128x128xf32>
    %cst_24 = arith.constant dense<0.000000e+00> : vector<3x128xf32>
    %20 = tpu.matmul %17, %19, %cst_24 {dimension_numbers = #tpu.dot_dimension_numbers<[1], [0], [0], [1], [0, 0, 1, 1], [], []>} : vector<3x128xf32>, vector<128x128xf32>, vector<3x128xf32> -> vector<3x128xf32>
    %21 = arith.addf %16, %20 : vector<3x128xf32>
    %cst_25 = arith.constant 0.000000e+00 : f32
    %22 = vector.broadcast %cst_25 : f32 to vector<3x128xf32>
    %23 = arith.maximumf %21, %22 : vector<3x128xf32>
    %c0_26 = arith.constant 0 : index
    %c0_27 = arith.constant 0 : index
    %24 = vector.load %arg5[%c0_26, %c0_27] : memref<8x128xf32, #tpu.memory_space<vmem>>, vector<3x128xf32>
    tpu.vector_store %arg5[%c0_26, %c0_27], %23 {strides = array<i32>} : memref<8x128xf32, #tpu.memory_space<vmem>>, vector<3x128xf32>,
    %c1_28 = arith.constant 1 : index
    %c0_29 = arith.constant 0 : index
    %c0_30 = arith.constant 0 : index
    %25 = vector.load %arg3[%c1_28, %c0_29, %c0_30] : memref<2x1x128xf32, #tpu.memory_space<vmem>>, vector<1x1x128xf32>
    %26 = vector.shape_cast %25 : vector<1x1x128xf32> to vector<1x128xf32>
    %c0_31 = arith.constant 0 : index
    %c0_32 = arith.constant 0 : index
    %27 = vector.load %arg5[%c0_31, %c0_32] : memref<8x128xf32, #tpu.memory_space<vmem>>, vector<1x128xf32>
    %c1_33 = arith.constant 1 : index
    %c0_34 = arith.constant 0 : index
    %c0_35 = arith.constant 0 : index
    %c0_36 = arith.constant 0 : index
    %28 = vector.load %arg2[%c1_33, %c0_34, %c0_35, %c0_36] : memref<2x3x128x128xf32, #tpu.memory_space<vmem>>, vector<1x1x128x128xf32>
    %29 = vector.shape_cast %28 : vector<1x1x128x128xf32> to vector<128x128xf32>
    %cst_37 = arith.constant dense<0.000000e+00> : vector<1x128xf32>
    %30 = tpu.matmul %27, %29, %cst_37 {dimension_numbers = #tpu.dot_dimension_numbers<[1], [0], [0], [1], [0, 0, 1, 1], [], []>} : vector<1x128xf32>, vector<128x128xf32>, vector<1x128xf32> -> vector<1x128xf32>
    %31 = arith.addf %26, %30 : vector<1x128xf32>
    %c1_38 = arith.constant 1 : index
    %c0_39 = arith.constant 0 : index
    %32 = vector.load %arg5[%c1_38, %c0_39] : memref<8x128xf32, #tpu.memory_space<vmem>>, vector<1x128xf32>
    %c1_40 = arith.constant 1 : index
    %c1_41 = arith.constant 1 : index
    %c0_42 = arith.constant 0 : index
    %c0_43 = arith.constant 0 : index
    %33 = vector.load %arg2[%c1_40, %c1_41, %c0_42, %c0_43] : memref<2x3x128x128xf32, #tpu.memory_space<vmem>>, vector<1x1x128x128xf32>
    %34 = vector.shape_cast %33 : vector<1x1x128x128xf32> to vector<128x128xf32>
    %cst_44 = arith.constant dense<0.000000e+00> : vector<1x128xf32>
    %35 = tpu.matmul %32, %34, %cst_44 {dimension_numbers = #tpu.dot_dimension_numbers<[1], [0], [0], [1], [0, 0, 1, 1], [], []>} : vector<1x128xf32>, vector<128x128xf32>, vector<1x128xf32> -> vector<1x128xf32>
    %36 = arith.addf %31, %35 : vector<1x128xf32>
    %c2_45 = arith.constant 2 : index
    %c0_46 = arith.constant 0 : index
    %37 = vector.load %arg5[%c2_45, %c0_46] : memref<8x128xf32, #tpu.memory_space<vmem>>, vector<1x128xf32>
    %c1_47 = arith.constant 1 : index
    %c2_48 = arith.constant 2 : index
    %c0_49 = arith.constant 0 : index
    %c0_50 = arith.constant 0 : index
    %38 = vector.load %arg2[%c1_47, %c2_48, %c0_49, %c0_50] : memref<2x3x128x128xf32, #tpu.memory_space<vmem>>, vector<1x1x128x128xf32>
    %39 = vector.shape_cast %38 : vector<1x1x128x128xf32> to vector<128x128xf32>
    %cst_51 = arith.constant dense<0.000000e+00> : vector<1x128xf32>
    %40 = tpu.matmul %37, %39, %cst_51 {dimension_numbers = #tpu.dot_dimension_numbers<[1], [0], [0], [1], [0, 0, 1, 1], [], []>} : vector<1x128xf32>, vector<128x128xf32>, vector<1x128xf32> -> vector<1x128xf32>
    %41 = arith.addf %36, %40 : vector<1x128xf32>
    %cst_52 = arith.constant 0.000000e+00 : f32
    %42 = vector.broadcast %cst_52 : f32 to vector<1x128xf32>
    %43 = arith.maximumf %41, %42 : vector<1x128xf32>
    %c0_53 = arith.constant 0 : index
    %c0_54 = arith.constant 0 : index
    %c0_55 = arith.constant 0 : index
    %44 = vector.load %arg4[%c0_53, %c0_54, %c0_55] : memref<1x1x128xf32, #tpu.memory_space<vmem>>, vector<1x1x128xf32>
    %45 = vector.shape_cast %44 : vector<1x1x128xf32> to vector<1x128xf32>
    %46 = vector.shape_cast %43 : vector<1x128xf32> to vector<1x1x128xf32>
    tpu.vector_store %arg4[%c0_53, %c0_54, %c0_55], %46 {strides = array<i32>} : memref<1x1x128xf32, #tpu.memory_space<vmem>>, vector<1x1x128xf32>,
    return
  }
  func.func @transform_0(%arg0: i32) -> (i32, i32, i32) {
    %c0_i32 = arith.constant 0 : i32
    %c0_i32_0 = arith.constant 0 : i32
    %c0_i32_1 = arith.constant 0 : i32
    return %arg0, %c0_i32, %c0_i32_0 : i32, i32, i32
  }
  func.func @transform_1(%arg0: i32) -> (i32, i32, i32, i32) {
    %c0_i32 = arith.constant 0 : i32
    %c0_i32_0 = arith.constant 0 : i32
    %c0_i32_1 = arith.constant 0 : i32
    %c0_i32_2 = arith.constant 0 : i32
    %c0_i32_3 = arith.constant 0 : i32
    return %c0_i32, %c0_i32_0, %c0_i32_1, %c0_i32_2 : i32, i32, i32, i32
  }
  func.func @transform_2(%arg0: i32) -> (i32, i32, i32) {
    %c0_i32 = arith.constant 0 : i32
    %c0_i32_0 = arith.constant 0 : i32
    %c0_i32_1 = arith.constant 0 : i32
    %c0_i32_2 = arith.constant 0 : i32
    return %c0_i32, %c0_i32_0, %c0_i32_1 : i32, i32, i32
  }
  func.func @transform_3(%arg0: i32) -> (i32, i32, i32) {
    %c0_i32 = arith.constant 0 : i32
    %c0_i32_0 = arith.constant 0 : i32
    %c0_i32_1 = arith.constant 0 : i32
    return %arg0, %c0_i32, %c0_i32_0 : i32, i32, i32
  }
}

</mosaic_0001>

<bundles_post_ra>
// kernel: cnn_encoder_forward.1
= control target key start
LH: loop header
LB: loop body
LE: loop exit
PB: predicated region body
PF: predicated region fallthrough
CT: control target
= control target key end

     0   :  { %8 = vsyncpa [#allocation4], 0  ;;  %s794_s0 = inlined_call_operand.vmem [shape: f32[2,5,128], index: 0, kind: input, shape index: {}]   ;;  %s795_s1 = inlined_call_operand.hbm [shape: f32[2,3,128,128], index: 1, kind: input, shape index: {}]   ;;  %s796_s2 = inlined_call_operand.vmem [shape: f32[2,1,128], index: 2, kind: input, shape index: {}]   ;;  %s797_s3 = inlined_call_operand.hbm [shape: f32[2,1,128], index: 3, kind: output, shape index: {}]  }
   0x1   :  { %9 = vsyncpa [#allocation5], 0 }
   0x2   :  { %11 = vsyncpa [#allocation5 + $0x1], 0  ;;  %s691_s12 = smov 0   ;;  %s693_s13 = smov 0  }
   0x3   :  { %s695_s14 = smov 0   ;;  %s697_s15 = smov 0  }
   0x4 LB: > { %s712_s16 = sadd.s32 4294967295, %s666_s15   ;;  %s507_s17 = sadd.s32 4294967294, %s666_s15   ;;  %s666_s15 = sphi %s697_s15, %s803_s15   ;;  %s662_s14 = sphi %s695_s14, %s802_s14   ;;  %s658_s13 = sphi %s693_s13, %s801_s13   ;;  %s654_s12 = sphi %s691_s12, %s800_s12  }
   0x5   : > { %s716_s18 = sadd.s32 1, %s666_s15   ;;  %s92_s19 = sadd.s32 1, %s662_s14 }
   0x6   : > { %s89_s20 = ssub.s32 %s666_s15, %s716_s18  ;;  %p102_p0 = scmp.ne.s32.totalorder %s662_s14, %s658_s13 }
   0x7   : > { %p90_p1 = scmp.eq.s32.totalorder %s89_s20, 0  ;;  %p103_p2 = scmp.eq.s32.totalorder %s712_s16, 1 }
   0x8   : > { %p108_p3 = scmp.ne.s32.totalorder %s658_s13, %s654_s12  ;;  %p109_p4 = scmp.eq.s32.totalorder %s507_s17, 1 }
   0x9   : > { %s727_s21 = scalar_select %p90_p1, %s662_s14, %s92_s19  }
   0xa   : > { %p729_p5 = por %p103_p2, %p102_p0  ;;  %p733_p6 = por %p109_p4, %p108_p3 }
   0xb   : > { %p508_p7 = scmp.ge.s32.totalorder %s666_s15, 1  ;;  %p116_p8 = scmp.lt.s32.totalorder %s666_s15, 3 }
   0xc   : > { %p531_p9 = scmp.eq.s32.totalorder %s712_s16, 0  ;;  %s127_s26 = sshll.u32 %s795_s1, 4  ;;  %s128_s26 = int_to_ptr.hbm [resolvable:$true] %s127_s26 }
   0xd   : > { %p117_p10 = pnand %p508_p7, %p116_p8  ;;  %s668_s27 = smov [#allocation3]  }
   0xe   : > { %s129_s28 = sshll.u32 %s668_s27, 4  ;;  %s669_s29 = smov 128   ;;  %s130_s28 = int_to_ptr.vmem [resolvable:$true] %s129_s28 }
   0xf   : > { %p523_p11 = pneg %p117_p10  ;;  %s670_s30 = smov 8  }
  0x10   : > { %155 = sbr.rel (%p117_p10) target bundleno = 341 (0x155), region = 32 }
  0x11   : > { %p524_p12 = pnand %p531_p9, %p523_p11 }
  0x13   : > { %526 = dma.hbm_to_vmem [thread:$0]  (!%p524_p12), %s128_s26, 12288, %s130_s28, [#allocation4], %s669_s29, %s669_s29, %s670_s30  }
  0x15   : > { %645 = dma.done.wait (%p531_p9), [#allocation4], 12288  }
  0x16   : > { %647 = vsyncadd (%p531_p9), [#allocation4], 4294955008  ;;  %v282_v0 = vld [vmem:[#allocation3 + $0x178] sm:$0xff]  ;;  %v281_v2 = vld [vmem:[#allocation3 + $0x170] sm:$0xff]  ;;  %p178_p13 = scmp.lt.s32.totalorder %s712_s16, 1  ;;  %s176_s19 = sand.u32 1, %s658_s13  }
  0x17   : > { %v204_v1 = vld [vmem:[#allocation3 + $0x78] sm:$0xff]  ;;  %283 = vmatpush.msra.mxu2 %v282_v0  ;;  %v203_v3 = vld [vmem:[#allocation3 + $0x70] sm:$0xff]  ;;  %v280_v5 = vld [vmem:[#allocation3 + $0x168] sm:$0xff]  ;;  %s436_s25 = scalar_lea.hbm %s797_s3, %s712_s16  ;;  %s177_s26 = scalar_lea.vmem [#allocation6], %s176_s19 }
  0x18   : > { %205 = vmatpush.msra.mxu0 %v204_v1  ;;  %v243_v4 = vld [vmem:[#allocation3 + $0xf8] sm:$0xff]  ;;  %v202_v6 = vld [vmem:[#allocation3 + $0x68] sm:$0xff]  ;;  %v242_v7 = vld [vmem:[#allocation3 + $0xf0] sm:$0xff]  ;;  %s179_s4 = scalar_select %p178_p13, %s712_s16, 1 }
  0x19   : > { %244 = vmatpush.msra.mxu1 %v243_v4  ;;  %284 = vmatpush.msra.mxu2 %v281_v2  ;;  %v241_v8 = vld [vmem:[#allocation3 + $0xe8] sm:$0xff]  ;;  %v279_v9 = vld [vmem:[#allocation3 + $0x160] sm:$0xff]  ;;  %v278_v12 = vld [vmem:[#allocation3 + $0x158] sm:$0xff]  ;;  %s438_s27 = sshll.u32 %s177_s26, 4  ;;  %s440_s28 = sshll.u32 %s436_s25, 4  ;;  %s439_s27 = int_to_ptr.vmem [resolvable:$true] %s438_s27  ;;  %s441_s28 = int_to_ptr.hbm [resolvable:$true] %s440_s28 }
  0x1a   : > { %206 = vmatpush.msra.mxu0 %v203_v3  ;;  %v201_v10 = vld [vmem:[#allocation3 + $0x60] sm:$0xff]  ;;  %v200_v13 = vld [vmem:[#allocation3 + $0x58] sm:$0xff]  ;;  %v277_v15 = vld [vmem:[#allocation3 + $0x150] sm:$0xff]  ;;  %s513_s5 = sshll.u32 %s179_s4, 3  ;;  %s428_s29 = scalar_lea.sflag [#allocation5], %s176_s19 }
  0x1b   : > { %245 = vmatpush.msra.mxu1 %v242_v7  ;;  %285 = vmatpush.msra.mxu2 %v280_v5  ;;  %v240_v11 = vld [vmem:[#allocation3 + $0xe0] sm:$0xff]  ;;  %v239_v14 = vld [vmem:[#allocation3 + $0xd8] sm:$0xff]  ;;  %v199_v16 = vld [vmem:[#allocation3 + $0x50] sm:$0xff]  ;;  %s181_s8 = scalar_lea.vmem %s794_s0, %s513_s5  ;;  %s614_s30 = sshra.s32 %s441_s28, 4  ;;  %s615_s30 = int_to_ptr.hbm [resolvable:$true] %s614_s30 }
  0x1c   : > { %207 = vmatpush.msra.mxu0 %v202_v6  ;;  %v238_v17 = vld [vmem:[#allocation3 + $0xd0] sm:$0xff]  ;;  %v276_v18 = vld [vmem:[#allocation3 + $0x148] sm:$0xff]  ;;  %v275_v21 = vld [vmem:[#allocation3 + $0x140] sm:$0xff]  ;;  %s616_s4 = scalar_lea.hbm %s615_s30, 1  ;;  %s620_s6 = scalar_lea.hbm %s797_s3, 2 }
  0x1d   : > { %246 = vmatpush.msra.mxu1 %v241_v8  ;;  %286 = vmatpush.msra.mxu2 %v279_v9  ;;  %v198_v19 = vld [vmem:[#allocation3 + $0x48] sm:$0xff]  ;;  %v197_v22 = vld [vmem:[#allocation3 + $0x40] sm:$0xff]  ;;  %v274_v24 = vld [vmem:[#allocation3 + $0x138] sm:$0xff]  ;;  %p617_p0 = scmp.ne.s32.totalorder %s615_s30, %s616_s4  ;;  %p621_p3 = scmp.lt.s32.totalorder %s615_s30, %s797_s3 }
  0x1e   : > { %208 = vmatpush.msra.mxu0 %v201_v10  ;;  %v237_v20 = vld [vmem:[#allocation3 + $0xc8] sm:$0xff]  ;;  %v236_v23 = vld [vmem:[#allocation3 + $0xc0] sm:$0xff]  ;;  %v196_v25 = vld [vmem:[#allocation3 + $0x38] sm:$0xff]  ;;  %p622_p4 = scmp.lt.s32.totalorder %s620_s6, %s616_s4 }
  0x1f   : > { %247 = vmatpush.msra.mxu1 %v240_v11  ;;  %287 = vmatpush.msra.mxu2 %v278_v12  ;;  %v235_v26 = vld [vmem:[#allocation3 + $0xb8] sm:$0xff]  ;;  %v273_v28 = vld [vmem:[#allocation3 + $0x130] sm:$0xff]  ;;  %v272_v33 = vld [vmem:[#allocation3 + $0x128] sm:$0xff]  ;;  %p618_p1 = pnand %p617_p0, %p729_p5 }
  0x20   : > { %209 = vmatpush.msra.mxu0 %v200_v13  ;;  %v182_v27 = vld [vmem:[%s181_s8] sm:$0x1f]  ;;  %v195_v29 = vld [vmem:[#allocation3 + $0x30] sm:$0xff]  ;;  %v194_v34 = vld [vmem:[#allocation3 + $0x28] sm:$0xff]  ;;  %p623_p7 = por %p622_p4, %p621_p3 }
  0x21   : > { %248 = vmatpush.msra.mxu1 %v239_v14  ;;  %288 = vmatpush.msra.mxu2 %v277_v15  ;;  %183 = vst [vmem:[#allocation2] sm:$0x1f] %v182_v27  ;;  %v325_v30 = vld [vmem:[#allocation3 + $0x1f8] sm:$0xff]  ;;  %v234_v31 = vld [vmem:[#allocation3 + $0xb0] sm:$0xff]  ;;  %v233_v35 = vld [vmem:[#allocation3 + $0xa8] sm:$0xff]  ;;  %p619_p2 = pneg %p618_p1 }
  0x22   : > { %210 = vmatpush.msra.mxu0 %v199_v16  ;;  %v324_v32 = vld [vmem:[#allocation3 + $0x1f0] sm:$0xff]  ;;  %326 = vmatpush.msra.mxu3 %v325_v30  ;;  %v323_v36 = vld [vmem:[#allocation3 + $0x1e8] sm:$0xff]  ;;  %v271_v37 = vld [vmem:[#allocation3 + $0x120] sm:$0xff] }
  0x23   : > { %249 = vmatpush.msra.mxu1 %v238_v17  ;;  %289 = vmatpush.msra.mxu2 %v276_v18  ;;  %v193_v38 = vld [vmem:[#allocation3 + $0x20] sm:$0xff]  ;;  %v270_v41 = vld [vmem:[#allocation3 + $0x118] sm:$0xff]  ;;  %v269_v45 = vld [vmem:[#allocation3 + $0x110] sm:$0xff]  ;;  %p624_p8 = pnand %p623_p7, %p619_p2 }
  0x24   : > { %211 = vmatpush.msra.mxu0 %v198_v19  ;;  %327 = vmatpush.msra.mxu3 %v324_v32  ;;  %v232_v39 = vld [vmem:[#allocation3 + $0xa0] sm:$0xff]  ;;  %v192_v42 = vld [vmem:[#allocation3 + $0x18] sm:$0xff]  ;;  %v191_v46 = vld [vmem:[#allocation3 + $0x10] sm:$0xff] }
  0x25   : > { %250 = vmatpush.msra.mxu1 %v237_v20  ;;  %290 = vmatpush.msra.mxu2 %v275_v21  ;;  %v322_v40 = vld [vmem:[#allocation3 + $0x1e0] sm:$0xff]  ;;  %v231_v43 = vld [vmem:[#allocation3 + $0x98] sm:$0xff]  ;;  %v230_v47 = vld [vmem:[#allocation3 + $0x90] sm:$0xff] }
  0x26   : > { %212 = vmatpush.msra.mxu0 %v197_v22  ;;  %328 = vmatpush.msra.mxu3 %v323_v36  ;;  %v321_v44 = vld [vmem:[#allocation3 + $0x1d8] sm:$0xff]  ;;  %v320_v48 = vld [vmem:[#allocation3 + $0x1d0] sm:$0xff]  ;;  %v268_v49 = vld [vmem:[#allocation3 + $0x108] sm:$0xff] }
  0x27   : > { %251 = vmatpush.msra.mxu1 %v236_v23  ;;  %291 = vmatpush.msra.mxu2 %v274_v24  ;;  %v190_v50 = vld [vmem:[#allocation3 + $0x8] sm:$0xff]  ;;  %v267_v53 = vld [vmem:[#allocation3 + $0x100] sm:$0xff]  ;;  %v364_v58 = vld [vmem:[#allocation3 + $0x278] sm:$0xff] }
  0x28   : > { %213 = vmatpush.msra.mxu0 %v196_v25  ;;  %329 = vmatpush.msra.mxu3 %v322_v40  ;;  %v229_v51 = vld [vmem:[#allocation3 + $0x88] sm:$0xff]  ;;  %v189_v54 = vld [vmem:[#allocation3] sm:$0xff]  ;;  %v265_v55 = vld [vmem:[#allocation2 + $0x2] sm:$0x7] }
  0x29   : > { %252 = vmatpush.msra.mxu1 %v235_v26  ;;  %292 = vmatpush.msra.mxu2 %v273_v28  ;;  %v319_v52 = vld [vmem:[#allocation3 + $0x1c8] sm:$0xff]  ;;  %v188_v56 = vld [vmem:[#allocation2] sm:$0x7]  ;;  %v228_v57 = vld [vmem:[#allocation3 + $0x80] sm:$0xff] }
  0x2a   : > { %214 = vmatpush.msra.mxu0 %v195_v29  ;;  %330 = vmatpush.msra.mxu3 %v321_v44  ;;  %v226_v59 = vld [vmem:[#allocation2 + $0x1] sm:$0x7]  ;;  %v363_v61 = vld [vmem:[#allocation3 + $0x270] sm:$0xff]  ;;  %v362_v63 = vld [vmem:[#allocation3 + $0x268] sm:$0xff] }
  0x2b   : > { %253 = vmatpush.msra.mxu1 %v234_v31  ;;  %293 = vmatpush.msra.mxu2 %v272_v33  ;;  %v403_v60 = vld [vmem:[#allocation3 + $0x2f8] sm:$0xff]  ;;  %v402_v62 = vld [vmem:[#allocation3 + $0x2f0] sm:$0xff]  ;;  %v401_v0 = vld [vmem:[#allocation3 + $0x2e8] sm:$0xff] }
  0x2c   : > { %215 = vmatpush.msra.mxu0 %v194_v34  ;;  %331 = vmatpush.msra.mxu3 %v320_v48  ;;  %v361_v1 = vld [vmem:[#allocation3 + $0x260] sm:$0xff]  ;;  %v360_v3 = vld [vmem:[#allocation3 + $0x258] sm:$0xff]  ;;  %v359_v5 = vld [vmem:[#allocation3 + $0x250] sm:$0xff] }
  0x2d   : > { %254 = vmatpush.msra.mxu1 %v233_v35  ;;  %294 = vmatpush.msra.mxu2 %v271_v37  ;;  %v400_v2 = vld [vmem:[#allocation3 + $0x2e0] sm:$0xff]  ;;  %v399_v4 = vld [vmem:[#allocation3 + $0x2d8] sm:$0xff]  ;;  %v398_v6 = vld [vmem:[#allocation3 + $0x2d0] sm:$0xff] }
  0x2e   : > { %216 = vmatpush.msra.mxu0 %v193_v38  ;;  %332 = vmatpush.msra.mxu3 %v319_v52  ;;  %v358_v7 = vld [vmem:[#allocation3 + $0x248] sm:$0xff]  ;;  %v318_v9 = vld [vmem:[#allocation3 + $0x1c0] sm:$0xff]  ;;  %v317_v12 = vld [vmem:[#allocation3 + $0x1b8] sm:$0xff] }
  0x2f   : > { %255 = vmatpush.msra.mxu1 %v232_v39  ;;  %295 = vmatpush.msra.mxu2 %v270_v41  ;;  %v397_v8 = vld [vmem:[#allocation3 + $0x2c8] sm:$0xff]  ;;  %v357_v10 = vld [vmem:[#allocation3 + $0x240] sm:$0xff]  ;;  %v356_v13 = vld [vmem:[#allocation3 + $0x238] sm:$0xff] }
  0x30   : > { %217 = vmatpush.msra.mxu0 %v192_v42  ;;  %v396_v11 = vld [vmem:[#allocation3 + $0x2c0] sm:$0xff]  ;;  %333 = vmatpush.msra.mxu3 %v318_v9  ;;  %v395_v14 = vld [vmem:[#allocation3 + $0x2b8] sm:$0xff]  ;;  %v316_v15 = vld [vmem:[#allocation3 + $0x1b0] sm:$0xff] }
  0x31   : > { %256 = vmatpush.msra.mxu1 %v231_v43  ;;  %296 = vmatpush.msra.mxu2 %v269_v45  ;;  %v355_v16 = vld [vmem:[#allocation3 + $0x230] sm:$0xff]  ;;  %v315_v18 = vld [vmem:[#allocation3 + $0x1a8] sm:$0xff]  ;;  %v314_v21 = vld [vmem:[#allocation3 + $0x1a0] sm:$0xff] }
  0x32   : > { %218 = vmatpush.msra.mxu0 %v191_v46  ;;  %334 = vmatpush.msra.mxu3 %v317_v12  ;;  %v394_v17 = vld [vmem:[#allocation3 + $0x2b0] sm:$0xff]  ;;  %v354_v19 = vld [vmem:[#allocation3 + $0x228] sm:$0xff]  ;;  %v353_v22 = vld [vmem:[#allocation3 + $0x220] sm:$0xff] }
  0x33   : > { %257 = vmatpush.msra.mxu1 %v230_v47  ;;  %297 = vmatpush.msra.mxu2 %v268_v49  ;;  %v393_v20 = vld [vmem:[#allocation3 + $0x2a8] sm:$0xff]  ;;  %v392_v23 = vld [vmem:[#allocation3 + $0x2a0] sm:$0xff]  ;;  %v313_v24 = vld [vmem:[#allocation3 + $0x198] sm:$0xff] }
  0x34   : > { %219 = vmatpush.msra.mxu0 %v190_v50  ;;  %335 = vmatpush.msra.mxu3 %v316_v15  ;;  %v352_v25 = vld [vmem:[#allocation3 + $0x218] sm:$0xff]  ;;  %v312_v27 = vld [vmem:[#allocation3 + $0x190] sm:$0xff]  ;;  %v311_v30 = vld [vmem:[#allocation3 + $0x188] sm:$0xff] }
  0x35   : > { %258 = vmatpush.msra.mxu1 %v229_v51  ;;  %298 = vmatpush.msra.mxu2 %v267_v53  ;;  %v391_v26 = vld [vmem:[#allocation3 + $0x298] sm:$0xff]  ;;  %v351_v28 = vld [vmem:[#allocation3 + $0x210] sm:$0xff]  ;;  %v350_v31 = vld [vmem:[#allocation3 + $0x208] sm:$0xff] }
  0x36   : > { %220 = vmatpush.msra.mxu0 %v189_v54  ;;  %299 = vmatmul.f32.vlgmr.msra.gmra.mxu2 %v265_v55  ;;  %v390_v29 = vld [vmem:[#allocation3 + $0x290] sm:$0xff]  ;;  %v389_v32 = vld [vmem:[#allocation3 + $0x288] sm:$0xff]  ;;  %v310_v33 = vld [vmem:[#allocation3 + $0x180] sm:$0xff] }
  0x37   : > { %221 = vmatmul.f32.vlgmr.msra.gmra.mxu0 %v188_v56  ;;  %259 = vmatpush.msra.mxu1 %v228_v57  ;;  %v349_v34 = vld [vmem:[#allocation3 + $0x200] sm:$0xff]  ;;  %v569_v36 = vld [vmem:[%s796_s2] ss:$0 sm:$0xff]  ;;  %v514_v47 = vld [vmem:[%s796_s2 + $0x1] sm:$0x1] }
  0x38   : > { %365 = vmatpush.msrb.mxu0 %v364_v58  ;;  %260 = vmatmul.f32.vlgmr.msra.gmra.mxu1 %v226_v59  ;;  %v388_v35 = vld [vmem:[#allocation3 + $0x280] sm:$0xff] }
  0x39   : > { %404 = vmatpush.msrb.mxu1 %v403_v60  ;;  %336 = vmatpush.msra.mxu3 %v315_v18 }
  0x3a   : > { %366 = vmatpush.msrb.mxu0 %v363_v61 }
  0x3b   : > { %405 = vmatpush.msrb.mxu1 %v402_v62  ;;  %337 = vmatpush.msra.mxu3 %v314_v21 }
  0x3c   : > { %367 = vmatpush.msrb.mxu0 %v362_v63 }
  0x3d   : > { %406 = vmatpush.msrb.mxu1 %v401_v0  ;;  %338 = vmatpush.msra.mxu3 %v313_v24 }
  0x3e   : > { %368 = vmatpush.msrb.mxu0 %v361_v1 }
  0x3f   : > { %407 = vmatpush.msrb.mxu1 %v400_v2  ;;  %339 = vmatpush.msra.mxu3 %v312_v27 }
  0x40   : > { %369 = vmatpush.msrb.mxu0 %v360_v3 }
  0x41   : > { %408 = vmatpush.msrb.mxu1 %v399_v4  ;;  %340 = vmatpush.msra.mxu3 %v311_v30 }
  0x42   : > { %370 = vmatpush.msrb.mxu0 %v359_v5 }
  0x43   : > { %409 = vmatpush.msrb.mxu1 %v398_v6  ;;  %341 = vmatpush.msra.mxu3 %v310_v33 }
  0x44   : > { %371 = vmatpush.msrb.mxu0 %v358_v7 }
  0x45   : > { %410 = vmatpush.msrb.mxu1 %v397_v8 }
  0x46   : > { %372 = vmatpush.msrb.mxu0 %v357_v10 }
  0x47   : > { %411 = vmatpush.msrb.mxu1 %v396_v11 }
  0x48   : > { %373 = vmatpush.msrb.mxu0 %v356_v13 }
  0x49   : > { %412 = vmatpush.msrb.mxu1 %v395_v14 }
  0x4a   : > { %374 = vmatpush.msrb.mxu0 %v355_v16 }
  0x4b   : > { %413 = vmatpush.msrb.mxu1 %v394_v17 }
  0x4c   : > { %375 = vmatpush.msrb.mxu0 %v354_v19 }
  0x4d   : > { %414 = vmatpush.msrb.mxu1 %v393_v20 }
  0x4e   : > { %376 = vmatpush.msrb.mxu0 %v353_v22 }
  0x4f   : > { %415 = vmatpush.msrb.mxu1 %v392_v23 }
  0x50   : > { %377 = vmatpush.msrb.mxu0 %v352_v25 }
  0x51   : > { %416 = vmatpush.msrb.mxu1 %v391_v26 }
  0x52   : > { %378 = vmatpush.msrb.mxu0 %v351_v28 }
  0x53   : > { %417 = vmatpush.msrb.mxu1 %v390_v29 }
  0x54   : > { %379 = vmatpush.msrb.mxu0 %v350_v31 }
  0x55   : > { %418 = vmatpush.msrb.mxu1 %v389_v32 }
  0x56   : > { %380 = vmatpush.msrb.mxu0 %v349_v34 }
  0x57   : > { %419 = vmatpush.msrb.mxu1 %v388_v35 }
  0xb4   : > { %v222_v37 = vpop.f32.mrf.mxu0 }
  0xb5   : > { %v225_v38 = vadd.f32 %v569_v36, %v222_v37  ;;  %v261_v39 = vpop.f32.mrf.mxu1 }
  0xb7   : > { %v264_v40 = vadd.f32 %v261_v39, %v225_v38 }
  0xb9   : > { %v300_v41 = vpop.f32.mrf.mxu2 }
  0xba   : > { %v303_v42 = vadd.f32 %v300_v41, %v264_v40 }
  0xbc   : > { %v304_v43 = vmax.f32 %v303_v42, 0.0 }
  0xbe   : > { %305 = vst [vmem:[#allocation2] sm:$0x7] %v304_v43 }
  0xc5   : > { %v308_v44 = vld [vmem:[#allocation2] sm:$0x1]  ;;  %v347_v45 = vld [vmem:[#allocation2 + $0x1] sm:$0x1]  ;;  %v386_v46 = vld [vmem:[#allocation2 + $0x2] sm:$0x1] }
  0xc6   : > { %342 = vmatmul.f32.vlgmr.msra.gmra.mxu3 %v308_v44  ;;  %381 = vmatmul.f32.vlgmr.msrb.gmra.mxu0 %v347_v45 }
  0xc7   : > { %420 = vmatmul.f32.vlgmr.msrb.gmra.mxu1 %v386_v46 }
 0x143   : > { %v382_v50 = vpop.f32.mrf.mxu0 }
 0x144   : > { %v421_v52 = vpop.f32.mrf.mxu1 }
 0x149   : > { %v343_v48 = vpop.f32.mrf.mxu3 }
 0x14a   : > { %v346_v49 = vadd.f32 %v514_v47, %v343_v48 }
 0x14c   : > { %v385_v51 = vadd.f32 %v382_v50, %v346_v49 }
 0x14e   : > { %v424_v53 = vadd.f32 %v421_v52, %v385_v51 }
 0x150   : > { %v425_v54 = vmax.f32 %v424_v53, 0.0 }
 0x152   : > { %426 = vst [vmem:[%s177_s26] sm:$0x1] %v425_v54 }
 0x153   : > { %627 = shalt.err (!%p624_p8)
}
 0x154   : > { %521 = dma.vmem_to_hbm [thread:$0]  (%p729_p5), %s439_s27, 16, %s441_s28, %s428_s29  }
 0x155 PF: > { %p533_p9 = scmp.ge.s32.totalorder %s666_s15, 2  ;;  %s452_s9 = sand.u32 1, %s654_s12  }
 0x156   : > { %s453_s10 = scalar_lea.sflag [#allocation5], %s452_s9 }
 0x157   : > { %p528_p10 = pnand %p533_p9, %p733_p6 }
 0x159   : > { %p529_p11 = pneg %p528_p10 }
 0x15b   : > { %649 = dma.done.wait (%p529_p11), %s453_s10, 16  }
 0x15c   : > { %651 = vsyncadd (%p529_p11), %s453_s10, 4294967280  ;;  %p14_p12 = scmp.ge.s32.totalorder %s716_s18, 4   ;;  %s800_s12 = smov %s658_s13 }
 0x15d   : > { %s801_s13 = smov %s662_s14  ;;  %s802_s14 = smov %s727_s21 }
 0x15e   : > { %s803_s15 = smov %s716_s18  ;;  %16 = sbr.rel (!%p14_p12) target bundleno = 4 (0x4), region = 78 }
 0x163   :  { %458 = vsyncpa [#allocation4], 1 }
 0x164   :  { %460 = vsyncpa [#allocation4 + $0x1], 1 }
 0x165   :  { %461 = vsyncpa [#allocation5], 1 }
 0x166   :  { %463 = vsyncpa [#allocation5 + $0x1], 1 }

</bundles_post_ra>
